<compile_context>
chip_gen: v5e
topology: v5e:2x2
jax: 0.10.0
libtpu: 0.0.40
codegen_flags: <defaults>
</compile_context>

<pallas_src>
import functools

import jax
import jax.numpy as jnp
from jax.experimental import pallas as pl
from jax.experimental.pallas import tpu as pltpu


def _round_up(x, m):
    return ((x + m - 1) // m) * m


def _pad2d(a, rows, cols):
    r, c = a.shape
    if r == rows and c == cols:
        return a
    return jnp.pad(a, ((0, rows - r), (0, cols - c)))


def _policy_kernel(x_ref, w1_ref, b1_ref, w2_ref, b2_ref, w3_ref, b3_ref, out_ref):
    # hidden layer 1: Linear + ReLU  (bf16 MXU inputs, f32 accumulation)
    h1 = jnp.dot(x_ref[...], w1_ref[...], preferred_element_type=jnp.float32) + b1_ref[...]
    h1 = jnp.maximum(h1, 0.0)
    # hidden layer 2: Linear + ReLU
    h2 = jnp.dot(h1.astype(jnp.bfloat16), w2_ref[...],
                 preferred_element_type=jnp.float32) + b2_ref[...]
    h2 = jnp.maximum(h2, 0.0)
    # output layer: Linear + tanh, stored as bf16 (lane-dense, halved writeback)
    o = jnp.dot(h2.astype(jnp.bfloat16), w3_ref[...],
                preferred_element_type=jnp.float32) + b3_ref[...]
    out_ref[...] = jnp.tanh(o).astype(out_ref.dtype)


def prepare_params(params):
    """One-time pad + bf16 cast of the MLP weights (hoisted out of the forward path)."""
    w1, b1 = params["w1"], params["b1"]
    w2, b2 = params["w2"], params["b2"]
    w3, b3 = params["w3"], params["b3"]

    state_dim, h1 = w1.shape
    h2, action_dim = w3.shape

    d_pad = _round_up(state_dim, 128)
    h1_p = _round_up(h1, 128)
    h2_p = _round_up(h2, 128)
    a_pad = _round_up(action_dim, 128)

    prepped = {
        "w1": _pad2d(w1, d_pad, h1_p).astype(jnp.bfloat16),
        "b1": _pad2d(b1, 1, h1_p).astype(jnp.float32),
        "w2": _pad2d(w2, h1_p, h2_p).astype(jnp.bfloat16),
        "b2": _pad2d(b2, 1, h2_p).astype(jnp.float32),
        "w3": _pad2d(w3, h2_p, a_pad).astype(jnp.bfloat16),
        "b3": _pad2d(b3, 1, a_pad).astype(jnp.float32),
    }
    meta = {"state_dim": state_dim, "action_dim": action_dim}
    return prepped, meta


def _pick_batch_tile(B, tb_max):
    """Batch tile: 16-aligned (bf16 sublanes); multiple of 256 and >=2 tiles when big."""
    b16 = _round_up(B, 16)
    if b16 <= 256:
        return b16
    half = _round_up((b16 + 1) // 2, 256)      # >= 2 tiles -> v7x megacore can split them
    return max(256, min(tb_max, half))


@functools.partial(jax.jit, static_argnames=("action_dim", "tb_max"))
def deterministic_policy_forward(states, prepped, *, action_dim, tb_max=2048):
    """states: [B, state_dim] float32. prepped: output of prepare_params()."""
    B, state_dim = states.shape
    d_pad, h1 = prepped["w1"].shape
    h2, a_pad = prepped["w3"].shape

    tb = _pick_batch_tile(B, tb_max)
    b_pad = _round_up(B, tb)
    grid = (b_pad // tb,)

    x_p = _pad2d(states, b_pad, d_pad).astype(jnp.bfloat16)

    batch_spec = lambda i: (i, 0)     # x / out tiles move with the grid
    resident = lambda i: (0, 0)       # weights & biases stay VMEM-resident

    flops = 2 * b_pad * (d_pad * h1 + h1 * h2 + h2 * a_pad)
    bytes_accessed = (x_p.size * 2
                      + prepped["w1"].size * 2 + prepped["w2"].size * 2 + prepped["w3"].size * 2
                      + prepped["b1"].size * 4 + prepped["b2"].size * 4 + prepped["b3"].size * 4
                      + b_pad * a_pad * 2)

    # VMEM estimate: double-buffered x/out tiles (bf16), f32 intermediates, resident weights.
    vmem_est = (2 * tb * d_pad * 2            # x double buffer
                + 2 * tb * a_pad * 2          # out double buffer
                + 2 * tb * (h1 + h2) * 4      # f32 h1/h2 temporaries (+ headroom)
                + 2 * ((d_pad * h1 + h1 * h2 + h2 * a_pad) * 2
                       + (h1 + h2 + a_pad) * 4))
    vmem_limit = max(32 * 1024 * 1024, min(64 * 1024 * 1024, 2 * vmem_est))

    out_padded = pl.pallas_call(
        _policy_kernel,
        out_shape=jax.ShapeDtypeStruct((b_pad, a_pad), jnp.bfloat16),
        grid=grid,
        in_specs=[
            pl.BlockSpec((tb, d_pad), batch_spec),
            pl.BlockSpec((d_pad, h1), resident),
            pl.BlockSpec((1, h1), resident),
            pl.BlockSpec((h1, h2), resident),
            pl.BlockSpec((1, h2), resident),
            pl.BlockSpec((h2, a_pad), resident),
            pl.BlockSpec((1, a_pad), resident),
        ],
        out_specs=pl.BlockSpec((tb, a_pad), batch_spec),
        compiler_params=pltpu.CompilerParams(
            dimension_semantics=("parallel",),
            vmem_limit_bytes=int(vmem_limit),
        ),
        cost_estimate=pl.CostEstimate(
            flops=flops,
            transcendentals=b_pad * a_pad,
            bytes_accessed=bytes_accessed,
        ),
    )(x_p, prepped["w1"], prepped["b1"], prepped["w2"], prepped["b2"],
      prepped["w3"], prepped["b3"])

    return out_padded[:B, :action_dim].astype(jnp.float32)


def init_params(key, state_dim, action_dim, hidden_units=(256, 256)):
    """Deterministic synthetic init (mimics shapes of the PyTorch MLP)."""
    k1, k2, k3 = jax.random.split(key, 3)
    h1, h2 = hidden_units

    def glorot(k, fan_in, fan_out):
        scale = jnp.sqrt(2.0 / (fan_in + fan_out))
        return jax.random.normal(k, (fan_in, fan_out), dtype=jnp.float32) * scale

    return {
        "w1": glorot(k1, state_dim, h1),
        "b1": jnp.zeros((1, h1), dtype=jnp.float32),
        "w2": glorot(k2, h1, h2),
        "b2": jnp.zeros((1, h2), dtype=jnp.float32),
        "w3": glorot(k3, h2, action_dim),
        "b3": jnp.zeros((1, action_dim), dtype=jnp.float32),
    }


def reference_forward(states, params):
    h1 = jnp.maximum(states @ params["w1"] + params["b1"], 0.0)
    h2 = jnp.maximum(h1 @ params["w2"] + params["b2"], 0.0)
    return jnp.tanh(h2 @ params["w3"] + params["b3"])


if __name__ == "__main__":
    key = jax.random.PRNGKey(0)
    k_x, k_p = jax.random.split(key)

    batch = 8
    state_dim = 16
    action_dim = 8

    states = jax.random.normal(k_x, (batch, state_dim), dtype=jnp.float32)
    params = init_params(k_p, state_dim, action_dim, hidden_units=(256, 256))
    prepped, meta = prepare_params(params)   # one-time pad + bf16 cast

    actions = deterministic_policy_forward(states, prepped,
                                            action_dim=meta["action_dim"])
    actions = jax.block_until_ready(actions)

    ref = reference_forward(states, params)
    assert actions.shape == (batch, action_dim)
    # bf16 MXU inputs / bf16 output with f32 accumulation -> a few e-3 deviation vs f32 ref.
    assert jnp.allclose(actions, ref, atol=2e-2, rtol=2e-2), \
        float(jnp.max(jnp.abs(actions - ref)))
    assert bool(jnp.all(jnp.abs(actions) <= 1.0))

    # Larger, non-tile-divisible batch: exercises the >=2-tile (megacore-shardable) path.
    big_states = jax.random.normal(k_x, (1000, state_dim), dtype=jnp.float32)
    big_actions = jax.block_until_ready(
        deterministic_policy_forward(big_states, prepped, action_dim=meta["action_dim"]))
    big_ref = reference_forward(big_states, params)
    assert big_actions.shape == (1000, action_dim)
    assert jnp.allclose(big_actions, big_ref, atol=2e-2, rtol=2e-2)

    print("KERNEL_OK")
</pallas_src>

<mosaic_0001>
module attributes {stable_mosaic.version = 11 : i64} {
  func.func @_policy_kernel(%arg0: i32, %arg1: memref<16x128xbf16, #tpu.memory_space<vmem>>, %arg2: memref<128x256xbf16, #tpu.memory_space<vmem>>, %arg3: memref<1x256xf32, #tpu.memory_space<vmem>>, %arg4: memref<256x256xbf16, #tpu.memory_space<vmem>>, %arg5: memref<1x256xf32, #tpu.memory_space<vmem>>, %arg6: memref<256x128xbf16, #tpu.memory_space<vmem>>, %arg7: memref<1x128xf32, #tpu.memory_space<vmem>>, %arg8: memref<16x128xbf16, #tpu.memory_space<vmem>>) attributes {dimension_semantics = [#tpu.dimension_semantics<parallel>], iteration_bounds = array<i64: 1>, scalar_prefetch = 0 : i64, scratch_operands = 0 : i64, tpu.core_type = #tpu.core_type<tc>, window_params = [{transform_indices = @transform_0, window_bounds = array<i64: 16, 128>}, {pipeline_mode = #tpu.pipeline_mode<synchronous>, transform_indices = @transform_1, window_bounds = array<i64: 128, 256>}, {pipeline_mode = #tpu.pipeline_mode<synchronous>, transform_indices = @transform_2, window_bounds = array<i64: 1, 256>}, {pipeline_mode = #tpu.pipeline_mode<synchronous>, transform_indices = @transform_3, window_bounds = array<i64: 256, 256>}, {pipeline_mode = #tpu.pipeline_mode<synchronous>, transform_indices = @transform_4, window_bounds = array<i64: 1, 256>}, {pipeline_mode = #tpu.pipeline_mode<synchronous>, transform_indices = @transform_5, window_bounds = array<i64: 256, 128>}, {pipeline_mode = #tpu.pipeline_mode<synchronous>, transform_indices = @transform_6, window_bounds = array<i64: 1, 128>}, {transform_indices = @transform_7, window_bounds = array<i64: 16, 128>}]} {
    %c0 = arith.constant 0 : index
    %c0_0 = arith.constant 0 : index
    %0 = vector.load %arg1[%c0, %c0_0] : memref<16x128xbf16, #tpu.memory_space<vmem>>, vector<16x128xbf16>
    %c0_1 = arith.constant 0 : index
    %c0_2 = arith.constant 0 : index
    %1 = vector.load %arg2[%c0_1, %c0_2] : memref<128x256xbf16, #tpu.memory_space<vmem>>, vector<128x256xbf16>
    %cst = arith.constant dense<0.000000e+00> : vector<16x256xf32>
    %2 = tpu.matmul %0, %1, %cst {dimension_numbers = #tpu.dot_dimension_numbers<[1], [0], [0], [1], [0, 0, 1, 1], [], []>} : vector<16x128xbf16>, vector<128x256xbf16>, vector<16x256xf32> -> vector<16x256xf32>
    %c0_3 = arith.constant 0 : index
    %c0_4 = arith.constant 0 : index
    %3 = vector.load %arg3[%c0_3, %c0_4] : memref<1x256xf32, #tpu.memory_space<vmem>>, vector<1x256xf32>
    %4 = vector.broadcast %3 : vector<1x256xf32> to vector<16x256xf32>
    %5 = arith.addf %2, %4 : vector<16x256xf32>
    %cst_5 = arith.constant 0.000000e+00 : f32
    %6 = vector.broadcast %cst_5 : f32 to vector<16x256xf32>
    %7 = arith.maximumf %5, %6 : vector<16x256xf32>
    %8 = arith.truncf %7 : vector<16x256xf32> to vector<16x256xbf16>
    %c0_6 = arith.constant 0 : index
    %c0_7 = arith.constant 0 : index
    %9 = vector.load %arg4[%c0_6, %c0_7] : memref<256x256xbf16, #tpu.memory_space<vmem>>, vector<256x256xbf16>
    %cst_8 = arith.constant dense<0.000000e+00> : vector<16x256xf32>
    %10 = tpu.matmul %8, %9, %cst_8 {dimension_numbers = #tpu.dot_dimension_numbers<[1], [0], [0], [1], [0, 0, 1, 1], [], []>} : vector<16x256xbf16>, vector<256x256xbf16>, vector<16x256xf32> -> vector<16x256xf32>
    %c0_9 = arith.constant 0 : index
    %c0_10 = arith.constant 0 : index
    %11 = vector.load %arg5[%c0_9, %c0_10] : memref<1x256xf32, #tpu.memory_space<vmem>>, vector<1x256xf32>
    %12 = vector.broadcast %11 : vector<1x256xf32> to vector<16x256xf32>
    %13 = arith.addf %10, %12 : vector<16x256xf32>
    %cst_11 = arith.constant 0.000000e+00 : f32
    %14 = vector.broadcast %cst_11 : f32 to vector<16x256xf32>
    %15 = arith.maximumf %13, %14 : vector<16x256xf32>
    %16 = arith.truncf %15 : vector<16x256xf32> to vector<16x256xbf16>
    %c0_12 = arith.constant 0 : index
    %c0_13 = arith.constant 0 : index
    %17 = vector.load %arg6[%c0_12, %c0_13] : memref<256x128xbf16, #tpu.memory_space<vmem>>, vector<256x128xbf16>
    %cst_14 = arith.constant dense<0.000000e+00> : vector<16x128xf32>
    %18 = tpu.matmul %16, %17, %cst_14 {dimension_numbers = #tpu.dot_dimension_numbers<[1], [0], [0], [1], [0, 0, 1, 1], [], []>} : vector<16x256xbf16>, vector<256x128xbf16>, vector<16x128xf32> -> vector<16x128xf32>
    %c0_15 = arith.constant 0 : index
    %c0_16 = arith.constant 0 : index
    %19 = vector.load %arg7[%c0_15, %c0_16] : memref<1x128xf32, #tpu.memory_space<vmem>>, vector<1x128xf32>
    %20 = vector.broadcast %19 : vector<1x128xf32> to vector<16x128xf32>
    %21 = arith.addf %18, %20 : vector<16x128xf32>
    %22 = math.tanh %21 : vector<16x128xf32>
    %23 = arith.truncf %22 : vector<16x128xf32> to vector<16x128xbf16>
    %c0_17 = arith.constant 0 : index
    %c0_18 = arith.constant 0 : index
    %24 = vector.load %arg8[%c0_17, %c0_18] : memref<16x128xbf16, #tpu.memory_space<vmem>>, vector<16x128xbf16>
    tpu.vector_store %arg8[%c0_17, %c0_18], %23 {strides = array<i32>} : memref<16x128xbf16, #tpu.memory_space<vmem>>, vector<16x128xbf16>,
    return
  }
  func.func @transform_0(%arg0: i32) -> (i32, i32) {
    %c0_i32 = arith.constant 0 : i32
    %c0_i32_0 = arith.constant 0 : i32
    return %arg0, %c0_i32 : i32, i32
  }
  func.func @transform_1(%arg0: i32) -> (i32, i32) {
    %c0_i32 = arith.constant 0 : i32
    %c0_i32_0 = arith.constant 0 : i32
    %c0_i32_1 = arith.constant 0 : i32
    return %c0_i32, %c0_i32_0 : i32, i32
  }
  func.func @transform_2(%arg0: i32) -> (i32, i32) {
    %c0_i32 = arith.constant 0 : i32
    %c0_i32_0 = arith.constant 0 : i32
    %c0_i32_1 = arith.constant 0 : i32
    return %c0_i32, %c0_i32_0 : i32, i32
  }
  func.func @transform_3(%arg0: i32) -> (i32, i32) {
    %c0_i32 = arith.constant 0 : i32
    %c0_i32_0 = arith.constant 0 : i32
    %c0_i32_1 = arith.constant 0 : i32
    return %c0_i32, %c0_i32_0 : i32, i32
  }
  func.func @transform_4(%arg0: i32) -> (i32, i32) {
    %c0_i32 = arith.constant 0 : i32
    %c0_i32_0 = arith.constant 0 : i32
    %c0_i32_1 = arith.constant 0 : i32
    return %c0_i32, %c0_i32_0 : i32, i32
  }
  func.func @transform_5(%arg0: i32) -> (i32, i32) {
    %c0_i32 = arith.constant 0 : i32
    %c0_i32_0 = arith.constant 0 : i32
    %c0_i32_1 = arith.constant 0 : i32
    return %c0_i32, %c0_i32_0 : i32, i32
  }
  func.func @transform_6(%arg0: i32) -> (i32, i32) {
    %c0_i32 = arith.constant 0 : i32
    %c0_i32_0 = arith.constant 0 : i32
    %c0_i32_1 = arith.constant 0 : i32
    return %c0_i32, %c0_i32_0 : i32, i32
  }
  func.func @transform_7(%arg0: i32) -> (i32, i32) {
    %c0_i32 = arith.constant 0 : i32
    %c0_i32_0 = arith.constant 0 : i32
    return %arg0, %c0_i32 : i32, i32
  }
}

</mosaic_0001>

<bundles_post_ra>
// kernel: deterministic_policy_forward.1
= control target key start
LH: loop header
LB: loop body
LE: loop exit
PB: predicated region body
PF: predicated region fallthrough
CT: control target
= control target key end

     0   :  { %12 = vsyncpa [#allocation3], 0  ;;  %s1138_s0 = inlined_call_operand.vmem [shape: bf16[16,128], index: 0, kind: input, shape index: {}]   ;;  %s1139_s1 = inlined_call_operand.hbm [shape: bf16[128,256], index: 1, kind: input, shape index: {}]   ;;  %s1140_s2 = inlined_call_operand.vmem [shape: f32[1,256], index: 2, kind: input, shape index: {}]   ;;  %s1141_s3 = inlined_call_operand.hbm [shape: bf16[256,256], index: 3, kind: input, shape index: {}]   ;;  %s1142_s4 = inlined_call_operand.vmem [shape: f32[1,256], index: 4, kind: input, shape index: {}]   ;;  %s1143_s5 = inlined_call_operand.hbm [shape: bf16[256,128], index: 5, kind: input, shape index: {}]   ;;  %s1144_s6 = inlined_call_operand.vmem [shape: f32[1,128], index: 6, kind: input, shape index: {}]   ;;  %s1145_s7 = inlined_call_operand.vmem [shape: bf16[16,128], index: 7, kind: output, shape index: {}]  }
   0x1   :  { %13 = vsyncpa [#allocation5], 0  ;;  %s35_s26 = sshll.u32 %s1141_s3, 4  ;;  %s1067_s27 = smov [#allocation4]   ;;  %s36_s26 = int_to_ptr.hbm [resolvable:$true] %s35_s26 }
   0x2   :  { %s37_s28 = sshll.u32 %s1067_s27, 4  ;;  %s20_s8 = sshll.u32 %s1139_s1, 4  ;;  %s38_s28 = int_to_ptr.vmem [resolvable:$true] %s37_s28  ;;  %s21_s8 = int_to_ptr.hbm [resolvable:$true] %s20_s8 }
   0x3   :  { %s1068_s9 = smov 128   ;;  %s1069_s10 = smov 8  }
   0x4   :  { %43 = dma.hbm_to_vmem [thread:$0]  %s36_s26, 4096, %s38_s28, [#allocation5], %s1068_s9, %s1068_s9, %s1069_s10  }
   0x5   :  { %s1070_s11 = smov [#allocation2]   ;;  %s50_s15 = sshll.u32 %s1143_s5, 4  ;;  %s51_s15 = int_to_ptr.hbm [resolvable:$true] %s50_s15 }
   0x6   :  { %s22_s12 = sshll.u32 %s1070_s11, 4  ;;  %s1071_s3 = smov [#allocation6]   ;;  %s23_s12 = int_to_ptr.vmem [resolvable:$true] %s22_s12 }
   0x7   :  { %28 = dma.hbm_to_vmem [thread:$0]  %s21_s8, 2048, %s23_s12, [#allocation3], %s1068_s9, %s1068_s9, %s1069_s10  }
   0x8   :  { %s52_s16 = sshll.u32 %s1071_s3, 4  ;;  %s1072_s17 = smov 64   ;;  %s53_s16 = int_to_ptr.vmem [resolvable:$true] %s52_s16 }
   0x9   :  { %s1073_s18 = smov 4  }
   0xa   :  { %58 = dma.hbm_to_vmem [thread:$0]  %s51_s15, 2048, %s53_s16, [#allocation5], %s1072_s17, %s1072_s17, %s1073_s18  }
   0xb   :  { %1063 = dma.done.wait [#allocation3], 2048  }
   0xc   :  { %1064 = vsyncadd [#allocation3], 4294965248 }
   0xd   :  { %1065 = dma.done.wait [#allocation5], 6144  }
   0xe   :  { %1066 = vsyncadd [#allocation5], 4294961152  ;;  %v711_v0 = vld [vmem:[#allocation2 + $0x70] sm:$0xf]  ;;  %v925_v1 = vld [vmem:[#allocation2 + $0x74] sm:$0xf0] }
   0xf   :  { %v924_v2 = vld [vmem:[#allocation2 + $0x74] sm:$0xf]  ;;  %v712_v3 = vor.u32 %v925_v1, %v711_v0  ;;  %v713_v4 = vld [vmem:[#allocation2 + $0x78] sm:$0xf0]  ;;  %v703_v5 = vld [vmem:[#allocation2 + $0x60] sm:$0xf] }
  0x10   :  { %v923_v6 = vld [vmem:[#allocation2 + $0x64] sm:$0xf0]  ;;  %v716_v7 = vor.u32 %v924_v2, %v713_v4  ;;  %v922_v8 = vld [vmem:[#allocation2 + $0x64] sm:$0xf]  ;;  %v705_v9 = vld [vmem:[#allocation2 + $0x68] sm:$0xf0] }
  0x11   :  { %183 = vmatpush.bf16.msra.mxu0 %v712_v3  ;;  %v704_v10 = vor.u32 %v923_v6, %v703_v5  ;;  %v708_v11 = vor.u32 %v922_v8, %v705_v9  ;;  %v695_v12 = vld [vmem:[#allocation2 + $0x50] sm:$0xf]  ;;  %v921_v13 = vld [vmem:[#allocation2 + $0x54] sm:$0xf0]  ;;  %v920_v14 = vld [vmem:[#allocation2 + $0x54] sm:$0xf] }
  0x12   :  { %197 = vmatpush.bf16.msra.mxu1 %v716_v7  ;;  %v697_v15 = vld [vmem:[#allocation2 + $0x58] sm:$0xf0]  ;;  %v696_v16 = vor.u32 %v921_v13, %v695_v12  ;;  %v687_v18 = vld [vmem:[#allocation2 + $0x40] sm:$0xf]  ;;  %v919_v19 = vld [vmem:[#allocation2 + $0x44] sm:$0xf0] }
  0x13   :  { %v700_v17 = vor.u32 %v920_v14, %v697_v15  ;;  %v918_v20 = vld [vmem:[#allocation2 + $0x44] sm:$0xf]  ;;  %v689_v21 = vld [vmem:[#allocation2 + $0x48] sm:$0xf0]  ;;  %v688_v22 = vor.u32 %v919_v19, %v687_v18  ;;  %v775_v23 = vld [vmem:[#allocation4 + $0x70] sm:$0xf] }
  0x14   :  { %v941_v24 = vld [vmem:[#allocation4 + $0x74] sm:$0xf0]  ;;  %v839_v25 = vld [vmem:[#allocation4 + $0xf0] sm:$0xf]  ;;  %v692_v26 = vor.u32 %v918_v20, %v689_v21  ;;  %v916_v31 = vld [vmem:[#allocation2 + $0x34] sm:$0xf] }
  0x15   :  { %184 = vmatpush.bf16.msra.mxu0 %v704_v10  ;;  %v679_v27 = vld [vmem:[#allocation2 + $0x30] sm:$0xf]  ;;  %v917_v28 = vld [vmem:[#allocation2 + $0x34] sm:$0xf0]  ;;  %v776_v29 = vor.u32 %v941_v24, %v775_v23  ;;  %v681_v32 = vld [vmem:[#allocation2 + $0x38] sm:$0xf0] }
  0x16   :  { %198 = vmatpush.bf16.msra.mxu1 %v708_v11  ;;  %v957_v30 = vld [vmem:[#allocation4 + $0xf4] sm:$0xf0]  ;;  %v767_v34 = vld [vmem:[#allocation4 + $0x60] sm:$0xf]  ;;  %v939_v35 = vld [vmem:[#allocation4 + $0x64] sm:$0xf0]  ;;  %v680_v38 = vor.u32 %v917_v28, %v679_v27  ;;  %v684_v43 = vor.u32 %v916_v31, %v681_v32 }
  0x17   :  { %v840_v33 = vor.u32 %v957_v30, %v839_v25  ;;  %415 = vmatpush.bf16.msra.mxu2 %v776_v29  ;;  %v831_v36 = vld [vmem:[#allocation4 + $0xe0] sm:$0xf]  ;;  %v955_v37 = vld [vmem:[#allocation4 + $0xe4] sm:$0xf0]  ;;  %v768_v41 = vor.u32 %v939_v35, %v767_v34  ;;  %v914_v44 = vld [vmem:[#allocation2 + $0x24] sm:$0xf] }
  0x18   :  { %v671_v39 = vld [vmem:[#allocation2 + $0x20] sm:$0xf]  ;;  %v915_v40 = vld [vmem:[#allocation2 + $0x24] sm:$0xf0]  ;;  %v832_v42 = vor.u32 %v955_v37, %v831_v36  ;;  %v759_v45 = vld [vmem:[#allocation4 + $0x50] sm:$0xf] }
  0x19   :  { %185 = vmatpush.bf16.msra.mxu0 %v696_v16  ;;  %429 = vmatpush.bf16.msra.mxu3 %v840_v33  ;;  %v937_v46 = vld [vmem:[#allocation4 + $0x54] sm:$0xf0]  ;;  %v673_v47 = vld [vmem:[#allocation2 + $0x28] sm:$0xf0]  ;;  %v823_v48 = vld [vmem:[#allocation4 + $0xd0] sm:$0xf]  ;;  %v672_v51 = vor.u32 %v915_v40, %v671_v39 }
  0x1a   :  { %199 = vmatpush.bf16.msra.mxu1 %v700_v17  ;;  %v953_v49 = vld [vmem:[#allocation4 + $0xd4] sm:$0xf0]  ;;  %v760_v50 = vor.u32 %v937_v46, %v759_v45  ;;  %v663_v52 = vld [vmem:[#allocation2 + $0x10] sm:$0xf]  ;;  %v751_v54 = vld [vmem:[#allocation4 + $0x40] sm:$0xf]  ;;  %v676_v56 = vor.u32 %v914_v44, %v673_v47 }
  0x1b   :  { %416 = vmatpush.bf16.msra.mxu2 %v768_v41  ;;  %v824_v53 = vor.u32 %v953_v49, %v823_v48  ;;  %v935_v55 = vld [vmem:[#allocation4 + $0x44] sm:$0xf0]  ;;  %v913_v57 = vld [vmem:[#allocation2 + $0x14] sm:$0xf0]  ;;  %v815_v58 = vld [vmem:[#allocation4 + $0xc0] sm:$0xf] }
  0x1c   :  { %v951_v59 = vld [vmem:[#allocation4 + $0xc4] sm:$0xf0]  ;;  %v912_v60 = vld [vmem:[#allocation2 + $0x14] sm:$0xf]  ;;  %v665_v61 = vld [vmem:[#allocation2 + $0x18] sm:$0xf0]  ;;  %v752_v62 = vor.u32 %v935_v55, %v751_v54  ;;  %v664_v63 = vor.u32 %v913_v57, %v663_v52 }
  0x1d   :  { %186 = vmatpush.bf16.msra.mxu0 %v688_v22  ;;  %430 = vmatpush.bf16.msra.mxu3 %v832_v42  ;;  %v816_v0 = vor.u32 %v951_v59, %v815_v58  ;;  %v668_v1 = vor.u32 %v912_v60, %v665_v61  ;;  %v655_v2 = vld [vmem:[#allocation2] sm:$0xf]  ;;  %v911_v3 = vld [vmem:[#allocation2 + $0x4] sm:$0xf0]  ;;  %v910_v4 = vld [vmem:[#allocation2 + $0x4] sm:$0xf] }
  0x1e   :  { %200 = vmatpush.bf16.msra.mxu1 %v692_v26  ;;  %v657_v5 = vld [vmem:[#allocation2 + $0x8] sm:$0xf0]  ;;  %v940_v6 = vld [vmem:[#allocation4 + $0x74] sm:$0xf]  ;;  %v777_v7 = vld [vmem:[#allocation4 + $0x78] sm:$0xf0]  ;;  %v656_v10 = vor.u32 %v911_v3, %v655_v2 }
  0x1f   :  { %417 = vmatpush.bf16.msra.mxu2 %v760_v50  ;;  %v956_v8 = vld [vmem:[#allocation4 + $0xf4] sm:$0xf]  ;;  %v841_v9 = vld [vmem:[#allocation4 + $0xf8] sm:$0xf0]  ;;  %v660_v11 = vor.u32 %v910_v4, %v657_v5  ;;  %v780_v12 = vor.u32 %v940_v6, %v777_v7  ;;  %v938_v14 = vld [vmem:[#allocation4 + $0x64] sm:$0xf] }
  0x20   :  { %v844_v13 = vor.u32 %v956_v8, %v841_v9  ;;  %v769_v15 = vld [vmem:[#allocation4 + $0x68] sm:$0xf0]  ;;  %v909_v16 = vld [vmem:[%s1138_s0] sm:$0xff]  ;;  %v936_v21 = vld [vmem:[#allocation4 + $0x54] sm:$0xf] }
  0x21   :  { %187 = vmatpush.bf16.msra.mxu0 %v680_v38  ;;  %431 = vmatpush.bf16.msra.mxu3 %v824_v53  ;;  %v954_v17 = vld [vmem:[#allocation4 + $0xe4] sm:$0xf]  ;;  %v833_v18 = vld [vmem:[#allocation4 + $0xe8] sm:$0xf0]  ;;  %v772_v19 = vor.u32 %v938_v14, %v769_v15  ;;  %v761_v22 = vld [vmem:[#allocation4 + $0x58] sm:$0xf0] }
  0x22   :  { %201 = vmatpush.bf16.msra.mxu1 %v684_v43  ;;  %v836_v20 = vor.u32 %v954_v17, %v833_v18  ;;  %v952_v23 = vld [vmem:[#allocation4 + $0xd4] sm:$0xf]  ;;  %v825_v24 = vld [vmem:[#allocation4 + $0xd8] sm:$0xf0]  ;;  %v764_v25 = vor.u32 %v936_v21, %v761_v22  ;;  %v934_v27 = vld [vmem:[#allocation4 + $0x44] sm:$0xf] }
  0x23   :  { %418 = vmatpush.bf16.msra.mxu2 %v752_v62  ;;  %v828_v26 = vor.u32 %v952_v23, %v825_v24  ;;  %v753_v28 = vld [vmem:[#allocation4 + $0x48] sm:$0xf0]  ;;  %v950_v29 = vld [vmem:[#allocation4 + $0xc4] sm:$0xf]  ;;  %v743_v33 = vld [vmem:[#allocation4 + $0x30] sm:$0xf] }
  0x24   :  { %v817_v30 = vld [vmem:[#allocation4 + $0xc8] sm:$0xf0]  ;;  %v756_v31 = vor.u32 %v934_v27, %v753_v28  ;;  %v933_v34 = vld [vmem:[#allocation4 + $0x34] sm:$0xf0]  ;;  %v807_v35 = vld [vmem:[#allocation4 + $0xb0] sm:$0xf] }
  0x25   :  { %188 = vmatpush.bf16.msra.mxu0 %v672_v51  ;;  %432 = vmatpush.bf16.msra.mxu3 %v816_v0  ;;  %v820_v32 = vor.u32 %v950_v29, %v817_v30  ;;  %v744_v36 = vor.u32 %v933_v34, %v743_v33  ;;  %v949_v37 = vld [vmem:[#allocation4 + $0xb4] sm:$0xf0]  ;;  %v932_v38 = vld [vmem:[#allocation4 + $0x34] sm:$0xf]  ;;  %v745_v39 = vld [vmem:[#allocation4 + $0x38] sm:$0xf0] }
  0x26   :  { %202 = vmatpush.bf16.msra.mxu1 %v676_v56  ;;  %v808_v40 = vor.u32 %v949_v37, %v807_v35  ;;  %v748_v41 = vor.u32 %v932_v38, %v745_v39  ;;  %v948_v42 = vld [vmem:[#allocation4 + $0xb4] sm:$0xf]  ;;  %v809_v43 = vld [vmem:[#allocation4 + $0xb8] sm:$0xf0]  ;;  %v735_v45 = vld [vmem:[#allocation4 + $0x20] sm:$0xf] }
  0x27   :  { %419 = vmatpush.bf16.msra.mxu2 %v744_v36  ;;  %v812_v44 = vor.u32 %v948_v42, %v809_v43  ;;  %v931_v46 = vld [vmem:[#allocation4 + $0x24] sm:$0xf0]  ;;  %v799_v48 = vld [vmem:[#allocation4 + $0xa0] sm:$0xf]  ;;  %v930_v50 = vld [vmem:[#allocation4 + $0x24] sm:$0xf] }
  0x28   :  { %v736_v47 = vor.u32 %v931_v46, %v735_v45  ;;  %v947_v49 = vld [vmem:[#allocation4 + $0xa4] sm:$0xf0]  ;;  %v737_v52 = vld [vmem:[#allocation4 + $0x28] sm:$0xf0]  ;;  %v946_v53 = vld [vmem:[#allocation4 + $0xa4] sm:$0xf] }
  0x29   :  { %189 = vmatpush.bf16.msra.mxu0 %v664_v63  ;;  %433 = vmatpush.bf16.msra.mxu3 %v808_v40  ;;  %v800_v51 = vor.u32 %v947_v49, %v799_v48  ;;  %v801_v54 = vld [vmem:[#allocation4 + $0xa8] sm:$0xf0]  ;;  %v740_v55 = vor.u32 %v930_v50, %v737_v52  ;;  %v727_v57 = vld [vmem:[#allocation4 + $0x10] sm:$0xf]  ;;  %v929_v58 = vld [vmem:[#allocation4 + $0x14] sm:$0xf0] }
  0x2a   :  { %203 = vmatpush.bf16.msra.mxu1 %v668_v1  ;;  %v804_v56 = vor.u32 %v946_v53, %v801_v54  ;;  %v791_v59 = vld [vmem:[#allocation4 + $0x90] sm:$0xf]  ;;  %v728_v60 = vor.u32 %v929_v58, %v727_v57  ;;  %v945_v61 = vld [vmem:[#allocation4 + $0x94] sm:$0xf0]  ;;  %v928_v62 = vld [vmem:[#allocation4 + $0x14] sm:$0xf] }
  0x2b   :  { %420 = vmatpush.bf16.msra.mxu2 %v736_v47  ;;  %v729_v63 = vld [vmem:[#allocation4 + $0x18] sm:$0xf0]  ;;  %v792_v0 = vor.u32 %v945_v61, %v791_v59  ;;  %v944_v2 = vld [vmem:[#allocation4 + $0x94] sm:$0xf]  ;;  %v719_v5 = vld [vmem:[#allocation4] sm:$0xf] }
  0x2c   :  { %v732_v1 = vor.u32 %v928_v62, %v729_v63  ;;  %v793_v3 = vld [vmem:[#allocation4 + $0x98] sm:$0xf0]  ;;  %v927_v6 = vld [vmem:[#allocation4 + $0x4] sm:$0xf0]  ;;  %v783_v7 = vld [vmem:[#allocation4 + $0x80] sm:$0xf] }
  0x2d   :  { %190 = vmatpush.bf16.msra.mxu0 %v656_v10  ;;  %434 = vmatpush.bf16.msra.mxu3 %v800_v51  ;;  %v796_v4 = vor.u32 %v944_v2, %v793_v3  ;;  %v720_v8 = vor.u32 %v927_v6, %v719_v5  ;;  %v943_v9 = vld [vmem:[#allocation4 + $0x84] sm:$0xf0]  ;;  %v926_v10 = vld [vmem:[#allocation4 + $0x4] sm:$0xf]  ;;  %v785_v15 = vld [vmem:[#allocation4 + $0x88] sm:$0xf0] }
  0x2e   :  { %204 = vmatpush.bf16.msra.mxu1 %v660_v11  ;;  %v721_v11 = vld [vmem:[#allocation4 + $0x8] sm:$0xf0]  ;;  %v942_v14 = vld [vmem:[#allocation4 + $0x84] sm:$0xf]  ;;  %v973_v17 = vld [vmem:[#allocation6 + $0x78] sm:$0xff] }
  0x2f   :  { %421 = vmatpush.bf16.msra.mxu2 %v728_v60  ;;  %v965_v18 = vld [vmem:[#allocation6 + $0x38] sm:$0xff]  ;;  %v971_v21 = vld [vmem:[#allocation6 + $0x68] sm:$0xff]  ;;  %v970_v22 = vld [vmem:[#allocation6 + $0x60] sm:$0xff] }
  0x30   :  { %191 = vmatmul.bf16.vlgmr.msra.gmra.mxu0 %v909_v16  ;;  %v91_v23 = vld [vmem:[%s1140_s2] sm:$0x3]  ;;  %v963_v40 = vld [vmem:[#allocation6 + $0x28] sm:$0xff]  ;;  %v968_v43 = vld [vmem:[#allocation6 + $0x50] sm:$0xff] }
  0x31   :  { %443 = vmatpush.bf16.msrb.mxu0 %v780_v12  ;;  %205 = vmatmul.bf16.vlgmr.msra.gmra.mxu1 %v909_v16  ;;  %v784_v12 = vor.u32 %v943_v9, %v783_v7  ;;  %v788_v16 = vor.u32 %v942_v14, %v785_v15  ;;  %v94_v27 = vperm.slane %v91_v23, 1  ;;  %v962_v42 = vld [vmem:[#allocation6 + $0x20] sm:$0xff]  ;;  %v967_v45 = vld [vmem:[#allocation6 + $0x48] sm:$0xff]  ;;  %v960_v46 = vld [vmem:[#allocation6 + $0x10] sm:$0xff] }
  0x32   :  { %457 = vmatpush.bf16.msrb.mxu1 %v844_v13  ;;  %435 = vmatpush.bf16.msra.mxu3 %v792_v0  ;;  %v724_v13 = vor.u32 %v926_v10, %v721_v11  ;;  %v966_v47 = vld [vmem:[#allocation6 + $0x40] sm:$0xff]  ;;  %v959_v48 = vld [vmem:[#allocation6 + $0x8] sm:$0xff] }
  0x33   :  { %422 = vmatpush.bf16.msra.mxu2 %v720_v8  ;;  %v958_v49 = vld [vmem:[#allocation6] sm:$0xff] }
  0x34   :  { %v249_v50 = vld [vmem:[%s1142_s4] sm:$0x3] }
  0x35   :  { %444 = vmatpush.bf16.msrb.mxu0 %v772_v19  ;;  %v972_v19 = vld [vmem:[#allocation6 + $0x70] sm:$0xff]  ;;  %v252_v52 = vperm.slane %v249_v50, 1 }
  0x36   :  { %458 = vmatpush.bf16.msrb.mxu1 %v836_v20  ;;  %436 = vmatpush.bf16.msra.mxu3 %v784_v12  ;;  %v964_v20 = vld [vmem:[#allocation6 + $0x30] sm:$0xff]  ;;  %v986_v12 = vld [vmem:[%s1144_s6] ss:$0 sm:$0xff] }
  0x37   :  { %609 = vmatpush.bf16.msrb.mxu2 %v965_v18 }
  0x39   :  { %445 = vmatpush.bf16.msrb.mxu0 %v764_v25 }
  0x3a   :  { %459 = vmatpush.bf16.msrb.mxu1 %v828_v26  ;;  %623 = vmatpush.bf16.msrb.mxu3 %v973_v17  ;;  %v93_v26 = vperm.slane %v91_v23, 0 }
  0x3b   :  { %610 = vmatpush.bf16.msrb.mxu2 %v964_v20 }
  0x3d   :  { %446 = vmatpush.bf16.msrb.mxu0 %v756_v31 }
  0x3e   :  { %460 = vmatpush.bf16.msrb.mxu1 %v820_v32  ;;  %624 = vmatpush.bf16.msrb.mxu3 %v972_v19 }
  0x3f   :  { %611 = vmatpush.bf16.msrb.mxu2 %v963_v40 }
  0x41   :  { %447 = vmatpush.bf16.msrb.mxu0 %v748_v41  ;;  %v969_v41 = vld [vmem:[#allocation6 + $0x58] sm:$0xff] }
  0x42   :  { %461 = vmatpush.bf16.msrb.mxu1 %v812_v44  ;;  %625 = vmatpush.bf16.msrb.mxu3 %v971_v21  ;;  %v961_v44 = vld [vmem:[#allocation6 + $0x18] sm:$0xff] }
  0x43   :  { %612 = vmatpush.bf16.msrb.mxu2 %v962_v42 }
  0x45   :  { %448 = vmatpush.bf16.msrb.mxu0 %v740_v55 }
  0x46   :  { %462 = vmatpush.bf16.msrb.mxu1 %v804_v56  ;;  %626 = vmatpush.bf16.msrb.mxu3 %v970_v22  ;;  %v251_v56 = vperm.slane %v249_v50, 0 }
  0x47   :  { %613 = vmatpush.bf16.msrb.mxu2 %v961_v44 }
  0x49   :  { %449 = vmatpush.bf16.msrb.mxu0 %v732_v1 }
  0x4a   :  { %463 = vmatpush.bf16.msrb.mxu1 %v796_v4  ;;  %627 = vmatpush.bf16.msrb.mxu3 %v969_v41 }
  0x4b   :  { %614 = vmatpush.bf16.msrb.mxu2 %v960_v46 }
  0x4d   :  { %450 = vmatpush.bf16.msrb.mxu0 %v724_v13 }
  0x4e   :  { %464 = vmatpush.bf16.msrb.mxu1 %v788_v16  ;;  %628 = vmatpush.bf16.msrb.mxu3 %v968_v43 }
  0x4f   :  { %615 = vmatpush.bf16.msrb.mxu2 %v959_v48 }
  0x52   :  { %629 = vmatpush.bf16.msrb.mxu3 %v967_v45 }
  0x53   :  { %616 = vmatpush.bf16.msrb.mxu2 %v958_v49 }
  0x56   :  { %630 = vmatpush.bf16.msrb.mxu3 %v966_v47 }
  0xad   :  { %v192_v24 = vpop.f32.mrf.mxu0 }
  0xae   :  { %v206_v25 = vpop.f32.mrf.mxu1  ;;  %v193_v28 = vadd.f32 %v192_v24, %v93_v26 }
  0xaf   :  { %v207_v29 = vadd.f32 %v206_v25, %v94_v27 }
  0xb0   :  { %v211_v34 = vmax.f32 %v193_v28, 0.0 }
  0xb1   :  { %v212_v36 = vmax.f32 %v207_v29, 0.0 }
  0xb5   :  { %v194_v30 = vpop.f32.mrf.mxu0 }
  0xb6   :  { %v195_v31 = vadd.f32 %v194_v30, %v93_v26  ;;  %v208_v32 = vpop.f32.mrf.mxu1 }
  0xb7   :  { %v209_v33 = vadd.f32 %v208_v32, %v94_v27 }
  0xb8   :  { %v213_v35 = vmax.f32 %v195_v31, 0.0 }
  0xb9   :  { %v214_v37 = vmax.f32 %v209_v33, 0.0 }
  0xba   :  { %v215_v38 = vpack.c.bf16 %v213_v35, %v211_v34 }
  0xbb   :  { %v216_v39 = vpack.c.bf16 %v214_v37, %v212_v36 }
  0xbc   :  { %423 = vmatmul.bf16.vlgmr.msra.gmra.mxu2 %v215_v38  ;;  %451 = vmatmul.bf16.vlgmr.msrb.gmra.mxu0 %v215_v38 }
  0xbd   :  { %437 = vmatmul.bf16.vlgmr.msra.gmra.mxu3 %v216_v39  ;;  %465 = vmatmul.bf16.vlgmr.msrb.gmra.mxu1 %v216_v39 }
 0x139   :  { %v452_v51 = vpop.f32.mrf.mxu0 }
 0x13a   :  { %v466_v53 = vpop.f32.mrf.mxu1  ;;  %v453_v54 = vadd.f32 %v452_v51, %v252_v52 }
 0x13c   :  { %v467_v59 = vadd.f32 %v466_v53, %v453_v54 }
 0x13e   :  { %v472_v0 = vmax.f32 %v467_v59, 0.0 }
 0x13f   :  { %v424_v55 = vpop.f32.mrf.mxu2 }
 0x140   :  { %v438_v57 = vpop.f32.mrf.mxu3  ;;  %v425_v62 = vadd.f32 %v424_v55, %v251_v56 }
 0x141   :  { %v454_v58 = vpop.f32.mrf.mxu0 }
 0x142   :  { %v455_v60 = vadd.f32 %v454_v58, %v252_v52  ;;  %v468_v61 = vpop.f32.mrf.mxu1  ;;  %v439_v3 = vadd.f32 %v438_v57, %v425_v62 }
 0x144   :  { %v469_v63 = vadd.f32 %v468_v61, %v455_v60  ;;  %v471_v8 = vmax.f32 %v439_v3, 0.0 }
 0x146   :  { %v474_v1 = vmax.f32 %v469_v63, 0.0 }
 0x147   :  { %v426_v2 = vpop.f32.mrf.mxu2 }
 0x148   :  { %v476_v4 = vpack.c.bf16 %v474_v1, %v472_v0  ;;  %v427_v5 = vadd.f32 %v426_v2, %v251_v56  ;;  %v440_v6 = vpop.f32.mrf.mxu3 }
 0x14a   :  { %v441_v7 = vadd.f32 %v440_v6, %v427_v5  ;;  %631 = vmatmul.bf16.vlgmr.msrb.gmra.mxu3 %v476_v4 }
 0x14c   :  { %v473_v9 = vmax.f32 %v441_v7, 0.0 }
 0x14e   :  { %v475_v10 = vpack.c.bf16 %v473_v9, %v471_v8 }
 0x150   :  { %617 = vmatmul.bf16.vlgmr.msrb.gmra.mxu2 %v475_v10 }
 0x1cd   :  { %v632_v11 = vpop.f32.mrf.mxu3 }
 0x1d3   :  { %v618_v13 = vpop.f32.mrf.mxu2 }
 0x1d4   :  { %v619_v14 = vadd.f32 %v986_v12, %v618_v13 }
 0x1d5   :  { %v634_v18 = vpop.f32.mrf.mxu3 }
 0x1d6   :  { %v633_v15 = vadd.f32 %v632_v11, %v619_v14 }
 0x1d8   :  { %987 = vtanh.f32 %v633_v15 }
 0x1db   :  { %v620_v16 = vpop.f32.mrf.mxu2 }
 0x1dc   :  { %v621_v17 = vadd.f32 %v986_v12, %v620_v16 }
 0x1de   :  { %v635_v19 = vadd.f32 %v634_v18, %v621_v17  ;;  %v988_v20 = vpop.eup %987 }
 0x1e0   :  { %989 = vtanh.f32 %v635_v19 }
 0x1e6   :  { %v990_v21 = vpop.eup %989 }
 0x1e7   :  { %v977_v22 = vpack.c.bf16 %v990_v21, %v988_v20 }
 0x1e9   :  { %978 = vst [vmem:[%s1145_s7] sm:$0xff] %v977_v22  }
 0x1ea   :  { %647 = vsyncpa [#allocation3], 1 }
 0x1eb   :  { %648 = vsyncpa [#allocation5], 1 }

</bundles_post_ra>
